<compile_context>
chip_gen: v7x
topology: tpu7x:2x2x1
jax: 0.10.0
libtpu: 0.0.40
codegen_flags: <defaults>
</compile_context>

<pallas_src>
import functools

import jax
import jax.numpy as jnp
from jax.experimental import pallas as pl
from jax.experimental.pallas import tpu as pltpu

IGNORE_INDEX = 255

_SUBLANE_MULT = {4: 8, 2: 16, 1: 32}  # sublane packing multiple per itemsize


def _round_up(x, m):
    return (x + m - 1) // m * m


# --------------------------------------------------------------------------- #
# Kernel
# --------------------------------------------------------------------------- #
def _ce_kernel(logits_ref, tgt_ref, sum_out, cnt_out, *, hw, tile, ragged):
    """One (image i, pixel-tile j) step: masked NLL partial for this tile.

    logits_ref: (1, C, T) input dtype — classes on sublanes, pixels on lanes
    tgt_ref:    (1, 1, T) integer class ids (255 = ignore)
    sum_out/cnt_out: (1, 1, 1, 1) f32 per-(i, j) partials
    """
    x = logits_ref[...]                                    # (1, C, T) native dtype
    tgt = tgt_ref[...].astype(jnp.int32)                   # (1, 1, T)

    # Class-axis max and target-class select in the native dtype (both exact;
    # keeps the heavy (1, C, T) streams in bf16 when the input is bf16).
    m = jnp.max(x, axis=1, keepdims=True)                  # (1, 1, T)
    cls = jax.lax.broadcasted_iota(jnp.int32, x.shape, 1)
    picked = jnp.sum(jnp.where(cls == tgt, x, jnp.array(0, x.dtype)),
                     axis=1, keepdims=True)                # (1, 1, T)

    # Numerically stable log-sum-exp in f32.
    xf = x.astype(jnp.float32)
    mf = m.astype(jnp.float32)
    lse = jnp.log(jnp.sum(jnp.exp(xf - mf), axis=1, keepdims=True)) + mf

    valid = tgt != IGNORE_INDEX
    if ragged:  # static: only the ragged-H*W variant pays for the tail mask
        j = pl.program_id(1)
        pix = j * tile + jax.lax.broadcasted_iota(jnp.int32, tgt.shape, 2)
        valid = jnp.logical_and(valid, pix < hw)

    # Lane-wise select (not multiply-by-mask) so OOB NaN/garbage cannot leak.
    loss_lane = jnp.where(valid, lse - picked.astype(jnp.float32), 0.0)

    sum_out[...] = jnp.sum(loss_lane, keepdims=True).reshape(1, 1, 1, 1)
    cnt_out[...] = jnp.sum(valid.astype(jnp.float32),
                           keepdims=True).reshape(1, 1, 1, 1)


# --------------------------------------------------------------------------- #
# VMEM accounting / tile selection
# --------------------------------------------------------------------------- #
def _block_bytes_per_pixel(c, logits_itemsize):
    """Padded VMEM bytes per pixel (lane) of one grid step, including double
    buffering of the streamed inputs and the in-kernel f32 temporaries."""
    c_pad = _round_up(c, _SUBLANE_MULT.get(logits_itemsize, 8))
    logits_blk = c_pad * logits_itemsize      # (1, C, T) block, C sublane-padded
    tgt_blk = 8 * 4                           # (1, 1, T) block pads to 8 sublanes of 32-bit
    inputs = 2 * (logits_blk + tgt_blk)       # double-buffered pipeline
    temps = 2 * _round_up(c, 8) * 4           # f32 upcast + exp intermediates
    return inputs + temps


def _choose_tile(hw, c, logits_itemsize, budget_bytes):
    """Largest pixel tile (multiple of 128) whose REAL VMEM footprint fits."""
    per_pixel = _block_bytes_per_pixel(c, logits_itemsize)
    max_tile = max(128, (budget_bytes // per_pixel) // 128 * 128)
    if hw <= max_tile:
        return hw  # single full-extent block (allowed even if not 128-aligned)
    return max_tile


def _vmem_budget_and_limit():
    """Generation-aware working-set budget and scoped VMEM limit."""
    try:
        cap = int(pltpu.get_tpu_info().vmem_capacity_bytes)
    except Exception:
        cap = 64 * 1024 * 1024                # conservative (v7x-sized) fallback
    if cap >= 100 * 1024 * 1024:              # v5e / v6e: 128 MiB physical
        budget = 64 * 1024 * 1024
    else:                                     # v7x: 64 MiB per TensorCore
        budget = int(cap * 0.65)
    limit = min(int(cap * 0.9), budget + 16 * 1024 * 1024)
    return budget, limit


# --------------------------------------------------------------------------- #
# pallas_call wrapper
# --------------------------------------------------------------------------- #
@functools.partial(jax.jit, static_argnames=("tile", "vmem_limit_bytes"))
def _ce_forward(logits, tgt, *, tile, vmem_limit_bytes):
    n, c, hw = logits.shape
    num_tiles = pl.cdiv(hw, tile)
    ragged = (hw % tile) != 0

    kernel = functools.partial(_ce_kernel, hw=hw, tile=tile, ragged=ragged)

    sums, cnts = pl.pallas_call(
        kernel,
        out_shape=(
            jax.ShapeDtypeStruct((n, num_tiles, 1, 1), jnp.float32),  # loss partials
            jax.ShapeDtypeStruct((n, num_tiles, 1, 1), jnp.float32),  # valid counts
        ),
        grid_spec=pltpu.PrefetchScalarGridSpec(
            num_scalar_prefetch=0,
            grid=(n, num_tiles),
            in_specs=[
                pl.BlockSpec((1, c, tile), lambda i, j: (i, 0, j)),
                pl.BlockSpec((1, 1, tile), lambda i, j: (i, 0, j)),
            ],
            out_specs=[
                pl.BlockSpec((1, 1, 1, 1), lambda i, j: (i, j, 0, 0)),
                pl.BlockSpec((1, 1, 1, 1), lambda i, j: (i, j, 0, 0)),
            ],
        ),
        compiler_params=pltpu.CompilerParams(
            dimension_semantics=("parallel", "parallel"),
            vmem_limit_bytes=vmem_limit_bytes,
        ),
    )(logits, tgt)

    # weight=None, reduction='mean': mean NLL over non-ignored pixels.
    # (All-ignored input yields 0/0 = nan, matching PyTorch.)
    return jnp.sum(sums) / jnp.sum(cnts)


def cross_entropy_loss_2d(output, target, *, tile=None):
    """output: (N, C, H, W) float logits; target: (N, H, W) integer class ids
    (255 = ignore).  Equivalent to nn.CrossEntropyLoss(ignore_index=255,
    reduction='mean')."""
    n, c, h, w = output.shape
    hw = h * w

    logits = output.reshape(n, c, hw)             # zero-copy, native NCHW

    # Keep targets in their narrowest HBM dtype; cast to int32 in-kernel.
    tdt = target.dtype
    narrow_ok = (tdt.kind in ("i", "u")
                 and tdt.itemsize <= 4
                 and not (tdt.kind == "i" and tdt.itemsize == 1))  # int8 can't hold 255
    if not narrow_ok:
        target = target.astype(jnp.int32)
    tgt = target.reshape(n, 1, hw)

    budget, limit = _vmem_budget_and_limit()
    itemsize = jnp.dtype(output.dtype).itemsize
    if tile is None:
        tile = _choose_tile(hw, c, itemsize, budget)
    else:
        tile = min(int(tile), hw)
        if tile < hw:
            tile = max(128, tile // 128 * 128)

    est = _block_bytes_per_pixel(c, itemsize) * _round_up(tile, 128)
    assert est <= limit, (
        f"estimated VMEM working set {est} B exceeds limit {limit} B "
        f"(tile={tile}, C={c})")

    return _ce_forward(logits, tgt, tile=tile, vmem_limit_bytes=limit)


# --------------------------------------------------------------------------- #
# Reference + tests
# --------------------------------------------------------------------------- #
def _reference(output, target):
    n, c, h, w = output.shape
    logits = jnp.transpose(output, (0, 2, 3, 1)).reshape(-1, c)
    tgt = target.reshape(-1).astype(jnp.int32)
    logp = jax.nn.log_softmax(logits.astype(jnp.float32), axis=-1)
    valid = tgt != IGNORE_INDEX
    safe_t = jnp.where(valid, tgt, 0)
    nll = -jnp.take_along_axis(logp, safe_t[:, None], axis=-1)[:, 0]
    nll = jnp.where(valid, nll, 0.0)
    return jnp.sum(nll) / jnp.sum(valid.astype(jnp.float32))


if __name__ == "__main__":
    key = jax.random.PRNGKey(0)
    k1, k2, k3, k4, k5, k6, k7, k8 = jax.random.split(key, 8)

    # Test 1: standard small case, f32 logits, int32 targets, ignored pixels.
    N, C, H, W = 2, 4, 16, 16
    output = jax.random.normal(k1, (N, C, H, W), dtype=jnp.float32)
    target = jax.random.randint(k2, (N, H, W), 0, C, dtype=jnp.int32)
    ignore_mask = jax.random.bernoulli(k3, 0.1, (N, H, W))
    target = jnp.where(ignore_mask, IGNORE_INDEX, target)

    loss = cross_entropy_loss_2d(output, target)
    jax.block_until_ready(loss)
    ref = _reference(output, target)
    assert jnp.allclose(loss, ref, rtol=1e-5, atol=1e-5), (loss, ref)

    # Test 2: ragged spatial extent + narrow (uint8) targets + N=1 multi-tile
    # grid (exercises the tail mask and the both-axes-parallel partials path).
    N2, C2, H2, W2 = 1, 5, 15, 20
    out2 = jax.random.normal(k4, (N2, C2, H2, W2), dtype=jnp.float32)
    tgt2 = jax.random.randint(k5, (N2, H2, W2), 0, C2, dtype=jnp.int32)
    ign2 = jax.random.bernoulli(k6, 0.15, (N2, H2, W2))
    tgt2 = jnp.where(ign2, IGNORE_INDEX, tgt2).astype(jnp.uint8)

    loss2 = cross_entropy_loss_2d(out2, tgt2, tile=128)   # force ragged tiles
    jax.block_until_ready(loss2)
    ref2 = _reference(out2, tgt2)
    assert jnp.allclose(loss2, ref2, rtol=1e-5, atol=1e-5), (loss2, ref2)

    # Test 3: bf16 logits (native-dtype max/select path; exp/log in f32).
    N3, C3, H3, W3 = 1, 8, 16, 16
    out3 = jax.random.normal(k7, (N3, C3, H3, W3),
                             dtype=jnp.float32).astype(jnp.bfloat16)
    tgt3 = jax.random.randint(k8, (N3, H3, W3), 0, C3, dtype=jnp.int32)

    loss3 = cross_entropy_loss_2d(out3, tgt3)
    jax.block_until_ready(loss3)
    ref3 = _reference(out3.astype(jnp.float32), tgt3)
    assert jnp.allclose(loss3, ref3, rtol=1e-5, atol=1e-5), (loss3, ref3)

    print("KERNEL_OK")
</pallas_src>

<mosaic_0001>
module attributes {stable_mosaic.version = 11 : i64} {
  func.func @_ce_kernel(%arg0: i32, %arg1: i32, %arg2: memref<1x4x256xf32, #tpu.memory_space<vmem>>, %arg3: memref<1x1x256xi32, #tpu.memory_space<vmem>>, %arg4: memref<1x1x1x1xf32, #tpu.memory_space<vmem>>, %arg5: memref<1x1x1x1xf32, #tpu.memory_space<vmem>>) attributes {dimension_semantics = [#tpu.dimension_semantics<parallel>, #tpu.dimension_semantics<parallel>], iteration_bounds = array<i64: 2, 1>, scalar_prefetch = 0 : i64, scratch_operands = 0 : i64, tpu.core_type = #tpu.core_type<tc>, window_params = [{transform_indices = @transform_0, window_bounds = array<i64: 1, 4, 256>}, {transform_indices = @transform_1, window_bounds = array<i64: 1, 1, 256>}, {transform_indices = @transform_2, window_bounds = array<i64: 1, 1, 1, 1>}, {transform_indices = @transform_3, window_bounds = array<i64: 1, 1, 1, 1>}]} {
    %c0 = arith.constant 0 : index
    %c0_0 = arith.constant 0 : index
    %c0_1 = arith.constant 0 : index
    %0 = vector.load %arg2[%c0, %c0_0, %c0_1] : memref<1x4x256xf32, #tpu.memory_space<vmem>>, vector<1x4x256xf32>
    %c0_2 = arith.constant 0 : index
    %c0_3 = arith.constant 0 : index
    %c0_4 = arith.constant 0 : index
    %1 = vector.load %arg3[%c0_2, %c0_3, %c0_4] : memref<1x1x256xi32, #tpu.memory_space<vmem>>, vector<1x1x256xi32>
    %cst = arith.constant dense<0xFF800000> : vector<1x256xf32>
    %2 = vector.multi_reduction <maximumf>, %0, %cst [1] : vector<1x4x256xf32> to vector<1x256xf32>
    %3 = vector.shape_cast %2 : vector<1x256xf32> to vector<1x1x256xf32>
    %4 = tpu.iota {dimensions = array<i32: 1>} : vector<1x4x256xi32>
    %5 = vector.broadcast %1 : vector<1x1x256xi32> to vector<1x4x256xi32>
    %6 = arith.cmpi eq, %4, %5 : vector<1x4x256xi32>
    %cst_5 = arith.constant 0.000000e+00 : f32
    %7 = vector.broadcast %cst_5 : f32 to vector<1x4x256xf32>
    %8 = arith.select %6, %0, %7 : vector<1x4x256xi1>, vector<1x4x256xf32>
    %cst_6 = arith.constant dense<0.000000e+00> : vector<1x256xf32>
    %9 = vector.multi_reduction <add>, %8, %cst_6 [1] : vector<1x4x256xf32> to vector<1x256xf32>
    %10 = vector.shape_cast %9 : vector<1x256xf32> to vector<1x1x256xf32>
    %11 = vector.broadcast %3 : vector<1x1x256xf32> to vector<1x4x256xf32>
    %12 = arith.subf %0, %11 : vector<1x4x256xf32>
    %13 = math.exp %12 : vector<1x4x256xf32>
    %cst_7 = arith.constant dense<0.000000e+00> : vector<1x256xf32>
    %14 = vector.multi_reduction <add>, %13, %cst_7 [1] : vector<1x4x256xf32> to vector<1x256xf32>
    %15 = vector.shape_cast %14 : vector<1x256xf32> to vector<1x1x256xf32>
    %16 = math.log %15 : vector<1x1x256xf32>
    %17 = arith.addf %16, %3 : vector<1x1x256xf32>
    %c255_i32 = arith.constant 255 : i32
    %18 = vector.broadcast %c255_i32 : i32 to vector<1x1x256xi32>
    %19 = arith.cmpi ne, %1, %18 : vector<1x1x256xi32>
    %20 = arith.subf %17, %10 : vector<1x1x256xf32>
    %cst_8 = arith.constant 0.000000e+00 : f32
    %21 = vector.broadcast %cst_8 : f32 to vector<1x1x256xf32>
    %22 = arith.select %19, %20, %21 : vector<1x1x256xi1>, vector<1x1x256xf32>
    %23 = vector.shape_cast %22 : vector<1x1x256xf32> to vector<1x1x1x256xf32>
    %cst_9 = arith.constant dense<0.000000e+00> : vector<1xf32>
    %24 = vector.multi_reduction <add>, %23, %cst_9 [1, 2, 3] : vector<1x1x1x256xf32> to vector<1xf32>
    %25 = vector.shape_cast %24 : vector<1xf32> to vector<1x1x1x1xf32>
    %26 = vector.extract %25[0, 0, 0, 0] : f32 from vector<1x1x1x1xf32>
    %27 = vector.broadcast %26 : f32 to vector<1x1x1xf32>
    %28 = vector.shape_cast %27 : vector<1x1x1xf32> to vector<1x1x1x1xf32>
    %c0_10 = arith.constant 0 : index
    %c0_11 = arith.constant 0 : index
    %c0_12 = arith.constant 0 : index
    %c0_13 = arith.constant 0 : index
    %29 = vector.load %arg4[%c0_10, %c0_11, %c0_12, %c0_13] : memref<1x1x1x1xf32, #tpu.memory_space<vmem>>, vector<1x1x1x1xf32>
    tpu.vector_store %arg4[%c0_10, %c0_11, %c0_12, %c0_13], %28 {strides = array<i32>} : memref<1x1x1x1xf32, #tpu.memory_space<vmem>>, vector<1x1x1x1xf32>,
    %30 = arith.extui %19 : vector<1x1x256xi1> to vector<1x1x256xi32>
    %31 = arith.sitofp %30 : vector<1x1x256xi32> to vector<1x1x256xf32>
    %32 = vector.shape_cast %31 : vector<1x1x256xf32> to vector<1x1x1x256xf32>
    %cst_14 = arith.constant dense<0.000000e+00> : vector<1xf32>
    %33 = vector.multi_reduction <add>, %32, %cst_14 [1, 2, 3] : vector<1x1x1x256xf32> to vector<1xf32>
    %34 = vector.shape_cast %33 : vector<1xf32> to vector<1x1x1x1xf32>
    %35 = vector.extract %34[0, 0, 0, 0] : f32 from vector<1x1x1x1xf32>
    %36 = vector.broadcast %35 : f32 to vector<1x1x1xf32>
    %37 = vector.shape_cast %36 : vector<1x1x1xf32> to vector<1x1x1x1xf32>
    %c0_15 = arith.constant 0 : index
    %c0_16 = arith.constant 0 : index
    %c0_17 = arith.constant 0 : index
    %c0_18 = arith.constant 0 : index
    %38 = vector.load %arg5[%c0_15, %c0_16, %c0_17, %c0_18] : memref<1x1x1x1xf32, #tpu.memory_space<vmem>>, vector<1x1x1x1xf32>
    tpu.vector_store %arg5[%c0_15, %c0_16, %c0_17, %c0_18], %37 {strides = array<i32>} : memref<1x1x1x1xf32, #tpu.memory_space<vmem>>, vector<1x1x1x1xf32>,
    return
  }
  func.func @transform_0(%arg0: i32, %arg1: i32) -> (i32, i32, i32) {
    %c0_i32 = arith.constant 0 : i32
    %c0_i32_0 = arith.constant 0 : i32
    return %arg0, %c0_i32, %arg1 : i32, i32, i32
  }
  func.func @transform_1(%arg0: i32, %arg1: i32) -> (i32, i32, i32) {
    %c0_i32 = arith.constant 0 : i32
    %c0_i32_0 = arith.constant 0 : i32
    return %arg0, %c0_i32, %arg1 : i32, i32, i32
  }
  func.func @transform_2(%arg0: i32, %arg1: i32) -> (i32, i32, i32, i32) {
    %c0_i32 = arith.constant 0 : i32
    %c0_i32_0 = arith.constant 0 : i32
    %c0_i32_1 = arith.constant 0 : i32
    return %arg0, %arg1, %c0_i32, %c0_i32_0 : i32, i32, i32, i32
  }
  func.func @transform_3(%arg0: i32, %arg1: i32) -> (i32, i32, i32, i32) {
    %c0_i32 = arith.constant 0 : i32
    %c0_i32_0 = arith.constant 0 : i32
    %c0_i32_1 = arith.constant 0 : i32
    return %arg0, %arg1, %c0_i32, %c0_i32_0 : i32, i32, i32, i32
  }
}

</mosaic_0001>

<bundles_post_ra>
// kernel: _ce_forward.1
= control target key start
LH: loop header
LB: loop body
LE: loop exit
PB: predicated region body
PF: predicated region fallthrough
CT: control target
= control target key end

     0   :  { %9 = vsyncpa [#allocation3], 0  ;;  %s981_s0 = inlined_call_operand.hbm [shape: f32[2,4,256], index: 0, kind: input, shape index: {}]   ;;  %s982_s1 = inlined_call_operand.hbm [shape: s32[2,1,256], index: 1, kind: input, shape index: {}]   ;;  %s983_s2 = inlined_call_operand.vmem [shape: f32[2,1,1,1], index: 2, kind: output, shape index: {0}]   ;;  %s984_s3 = inlined_call_operand.vmem [shape: f32[2,1,1,1], index: 3, kind: output, shape index: {1}]  }
   0x1   :  { %11 = vsyncpa [#allocation3 + $0x1], 0 }
   0x2   :  { %12 = vsyncpa [#allocation5], 0 }
   0x3   :  { %14 = vsyncpa [#allocation5 + $0x1], 0  ;;  %s796_s12 = smov 0   ;;  %s798_s13 = smov 0  }
   0x4   :  { %s800_s14 = smov 0   ;;  %s802_s15 = smov 0  }
   0x5   :  { %s804_s16 = smov 0   ;;  %s806_s17 = smov 0  }
   0x6 LB: > { %s565_s18 = sadd.s32 4294967295, %s770_s17   ;;  %s32_s19 = sadd.s32 1, %s766_s16  ;;  %s770_s17 = sphi %s806_s17, %s20_s17   ;;  %s766_s16 = sphi %s804_s16, %s998_s16   ;;  %s762_s15 = sphi %s802_s15, %s997_s15   ;;  %s758_s14 = sphi %s800_s14, %s996_s14   ;;  %s754_s13 = sphi %s798_s13, %s995_s13   ;;  %s750_s12 = sphi %s796_s12, %s994_s12  }
   0x7   : > { %p34_p0 = scmp.ge.s32.totalorder %s32_s19, 2  ;;  %s41_s20 = sadd.s32 1, %s758_s14 }
   0x8   : > { %p48_p1 = scmp.ne.s32.totalorder %s758_s14, %s754_s13  ;;  %p49_p2 = scmp.eq.s32.totalorder %s770_s17, 0 }
   0x9   : > { %s1000_s19 = smov (%p34_p0, %s32_s19), 0  ;;  %p54_p4 = scmp.ne.s32.totalorder %s754_s13, %s750_s12 }
   0xa   : > { %p832_p3 = por %p49_p2, %p48_p1  ;;  %s36_s22 = ssub.s32 %s766_s16, %s1000_s19 }
   0xb   : > { %p55_p5 = scmp.eq.s32.totalorder %s565_s18, 0  ;;  %p39_p6 = scmp.eq.s32.totalorder %s36_s22, 0 }
   0xc   : > { %p598_p8 = scmp.lt.s32.totalorder %s770_s17, 2  ;;  %s848_s25 = sand.u32 1, %s758_s14  }
   0xd   : > { %p839_p7 = por %p55_p5, %p54_p4  ;;  %s581_s26 = sshll.u32 %s766_s16, 7 }
   0xe   : > { %s845_s24 = scalar_select %p39_p6, %s758_s14, %s41_s20  }
   0xf   : > { %s987_s23 = scalar_select %p839_p7, 1, 0 }
  0x10   : > { %s569_s27 = sshll.u32 %s848_s25, 3  ;;  %s855_s30 = scalar_lea.hbm %s981_s0, %s581_s26 }
  0x11   : > { %s166_s4 = scalar_lea.vmem [#allocation2], %s569_s27  ;;  %p859_p9 = pnand %p598_p8, %p832_p3 }
  0x12   : > { %s176_s5 = sshll.u32 %s166_s4, 4  ;;  %s163_s7 = scalar_lea.sflag [#allocation3], %s848_s25  ;;  %s863_s5 = int_to_ptr.vmem [resolvable:$true] %s176_s5 }
  0x13   : > { %s656_s8 = scalar_lea.hbm %s855_s30, 128  ;;  %p658_p13 = pneg %p859_p9 }
  0x14   : > { %p657_p12 = scmp.ne.s32.totalorder %s855_s30, %s656_s8  ;;  %s661_s11 = scalar_lea.hbm %s981_s0, 256 }
  0x15   : > { %p662_p2 = scmp.lt.u32.totalorder %s855_s30, %s981_s0  ;;  %p663_p3 = scmp.lt.u32.totalorder %s661_s11, %s656_s8 }
  0x16   : > { %p659_p0 = pnand %p658_p13, %p657_p12  ;;  %p665_p5 = scmp.lt.u32.totalorder %s656_s8, %s855_s30 }
  0x17   : > { %p664_p4 = por %p663_p3, %p662_p2 }
  0x18   : > { %p660_p1 = pneg %p659_p0 }
  0x19   : > { %p666_p6 = por %p665_p5, %p664_p4 }
  0x1b   : > { %p667_p8 = pnand %p666_p6, %p660_p1 }
  0x1d   : > { %670 = shalt.err (!%p667_p8)
}
  0x1e   : > { %s671_s20 = scalar_lea.vmem %s863_s5, 128  ;;  %s772_s21 = smov [#allocation2]  }
  0x1f   : > { %p672_p12 = scmp.ne.s32.totalorder %s863_s5, %s671_s20  ;;  %s676_s22 = sshll.u32 %s772_s21, 4  ;;  %s677_s22 = int_to_ptr.vmem [resolvable:$false] %s676_s22 }
  0x20   : > { %s678_s26 = scalar_lea.vmem %s677_s22, 256  ;;  %p679_p11 = scmp.lt.s32.totalorder %s863_s5, %s677_s22 }
  0x21   : > { %p674_p0 = pnand %p672_p12, %p658_p13  ;;  %p680_p2 = scmp.lt.s32.totalorder %s678_s26, %s671_s20 }
  0x23   : > { %p675_p10 = pneg %p674_p0  ;;  %p681_p3 = por %p680_p2, %p679_p11 }
  0x25   : > { %p682_p4 = pnand %p681_p3, %p675_p10 }
  0x27   : > { %685 = shalt.err (!%p682_p4)
}
  0x28   : > { %594 = dma.hbm_to_vmem [thread:$0]  (!%p859_p9), %s855_s30, 128, %s863_s5, %s163_s7  }
  0x29   : > { %p989_p1 = scmp.lt.s32.totalorder %s770_s17, 3  ;;  %p990_p5 = scmp.ge.s32.totalorder %s770_s17, 1 }
  0x2a   : > { %s572_s28 = sshll.u32 %s848_s25, 1  ;;  %s582_s29 = sshll.u32 %s766_s16, 5 }
  0x2b   : > { %p897_p6 = pnand %p990_p5, %p989_p1  ;;  %s906_s9 = scalar_lea.hbm %s982_s1, %s582_s29 }
  0x2c   : > { %s187_s10 = scalar_lea.vmem [#allocation4], %s572_s28  ;;  %s184_s30 = scalar_lea.sflag [#allocation5], %s848_s25 }
  0x2d   : > { %s991_s27 = scalar_select %p897_p6, 1, 0 }
  0x2e   : > { %s197_s11 = sshll.u32 %s187_s10, 4  ;;  %s686_s5 = scalar_lea.hbm %s906_s9, 32  ;;  %s198_s11 = int_to_ptr.vmem [resolvable:$true] %s197_s11 }
  0x2f   : > { %p687_p10 = scmp.ne.s32.totalorder %s906_s9, %s686_s5  ;;  %s691_s18 = scalar_lea.hbm %s982_s1, 64 }
  0x30   : > { %p692_p12 = scmp.lt.u32.totalorder %s906_s9, %s982_s1  ;;  %p693_p0 = scmp.lt.u32.totalorder %s691_s18, %s686_s5 }
  0x31   : > { %p689_p11 = pnand %p687_p10, %p658_p13  ;;  %p695_p3 = scmp.lt.u32.totalorder %s686_s5, %s906_s9 }
  0x32   : > { %p694_p2 = por %p693_p0, %p692_p12 }
  0x33   : > { %p690_p8 = pneg %p689_p11 }
  0x34   : > { %p696_p4 = por %p695_p3, %p694_p2 }
  0x36   : > { %p697_p1 = pnand %p696_p4, %p690_p8 }
  0x38   : > { %700 = shalt.err (!%p697_p1)
}
  0x39   : > { %s701_s25 = scalar_lea.vmem %s198_s11, 32  ;;  %s773_s22 = smov [#allocation4]  }
  0x3a   : > { %p702_p5 = scmp.ne.s32.totalorder %s198_s11, %s701_s25  ;;  %s706_s26 = sshll.u32 %s773_s22, 4  ;;  %s707_s26 = int_to_ptr.vmem [resolvable:$false] %s706_s26 }
  0x3b   : > { %s708_s28 = scalar_lea.vmem %s707_s26, 64  ;;  %p709_p7 = scmp.lt.s32.totalorder %s198_s11, %s707_s26 }
  0x3c   : > { %p704_p10 = pnand %p702_p5, %p658_p13  ;;  %p710_p6 = scmp.lt.s32.totalorder %s708_s28, %s701_s25 }
  0x3e   : > { %p705_p11 = pneg %p704_p10  ;;  %p711_p0 = por %p710_p6, %p709_p7 }
  0x40   : > { %p712_p12 = pnand %p711_p0, %p705_p11 }
  0x42   : > { %715 = shalt.err (!%p712_p12)
}
  0x43   : > { %597 = dma.hbm_to_vmem [thread:$0]  (!%p859_p9), %s906_s9, 32, %s198_s11, %s184_s30  }
  0x44   : > { %p992_p8 = scmp.ne.s32.totalorder %s991_s27, 0 }
  0x45   : > { %s208_s29 = sand.u32 (!%p992_p8), 1, %s754_s13   ;;  %p993_p13 = scmp.ne.s32.totalorder (!%p992_p8), %s987_s23, 0 }
  0x46   : > { %206 = sbr.rel (%p992_p8) target bundleno = 368 (0x170), region = 28  ;;  %s576_s4 = sshll.u32 (!%p992_p8), %s208_s29, 3 }
  0x47   : > { %s209_s8 = scalar_lea.sflag (!%p992_p8), [#allocation3], %s208_s29  ;;  %s212_s10 = scalar_lea.vmem (!%p992_p8), [#allocation2], %s576_s4 }
  0x4d   : > { %741 = dma.done.wait (%p993_p13), %s209_s8, 128  }
  0x4e   : > { %743 = vsyncadd (%p993_p13), %s209_s8, 4294967168  ;;  %s577_s5 = sshll.u32 %s208_s29, 1  ;;  %s218_s7 = scalar_lea.sflag [#allocation5], %s208_s29 }
  0x4f   : > { %s221_s6 = scalar_lea.vmem [#allocation4], %s577_s5 }
  0x50   : > { %745 = dma.done.wait (%p993_p13), %s218_s7, 32  }
  0x51   : > { %747 = vsyncadd (%p993_p13), %s218_s7, 4294967264  ;;  %vm275_vm0 = vcmask 1043456   ;;  %v270_v0 = vld [vmem:[%s212_s10] sm:$0xff]  ;;  %v290_v15 = vlaneseq  ;;  %v271_v22 = vld [vmem:[%s221_s6] sm:$0x3]  ;;  %vm381_vm4 = vcmask 1040384  }
  0x52   : > { %v273_v1 = vcombine.high %v270_v0, %v270_v0  ;;  %v276_v2 = vsel %vm275_vm0, %v270_v0, -inf  ;;  %v774_v56 = vmov 1966171168   ;;  %vm348_vm3 = vcmp.ne.s32.totalorder %v271_v22, 255  ;;  %p258_p7 = scmp.lt.s32.totalorder %s762_s15, 1 }
  0x53   : > { %v277_v3 = vrot.slane %v276_v2, 4  ;;  %v291_v17 = vshrl.u32 %v290_v15, 7  ;;  %v355_v57 = vunpack.c.l.s4 %v774_v56  ;;  %vm395_vm5 = vcmask 0  }
  0x54   : > { %v283_v4 = vsel %vm275_vm0, %v273_v1, -inf  ;;  %s1002_s15 = smov (!%p258_p7, %s762_s15), 1 }
  0x55   : > { %v278_v5 = vmax.f32 %v276_v2, %v277_v3  ;;  %v284_v6 = vrot.slane %v283_v4, 4  ;;  %v941_v20 = vsub.s32 0, %v291_v17  ;;  %v943_v23 = vsub.s32 1, %v291_v17  ;;  %s263_s9 = scalar_lea.vmem %s983_s2, %s1002_s15  ;;  %s269_s18 = scalar_lea.vmem %s984_s3, %s1002_s15 }
  0x57   : > { %v279_v7 = vrot.slane %v278_v5, 2  ;;  %v285_v8 = vmax.f32 %v283_v4, %v284_v6  ;;  %v295_v24 = vrot.slane %v271_v22, %v941_v20  ;;  %v299_v25 = vrot.slane %v271_v22, %v943_v23 }
  0x59   : > { %v280_v9 = vmax.f32 %v278_v5, %v279_v7  ;;  %v286_v10 = vrot.slane %v285_v8, 2  ;;  %vm300_vm1 = vcmp.eq.s32.totalorder %v291_v17, %v295_v24  ;;  %vm301_vm2 = vcmp.eq.s32.totalorder %v291_v17, %v299_v25 }
  0x5a   : > { %v302_v26 = vsel %vm300_vm1, %v270_v0, 0.0  ;;  %v303_v28 = vsel %vm301_vm2, %v273_v1, 0.0  ;;  %v356_v1 = vunpack.c.0.s8 %v355_v57 }
  0x5b   : > { %v281_v11 = vrot.slane %v280_v9, 1  ;;  %v287_v12 = vmax.f32 %v285_v8, %v286_v10  ;;  %v304_v31 = vsel %vm275_vm0, %v302_v26, 0.0  ;;  %v311_v34 = vsel %vm275_vm0, %v303_v28, 0.0 }
  0x5c   : > { %v305_v37 = vrot.slane %v304_v31, 4  ;;  %v312_v40 = vrot.slane %v311_v34, 4  ;;  %v359_v5 = vsub.s32 %v356_v1, %v291_v17  ;;  %v775_v8 = vmov 0.0  }
  0x5d   : > { %v282_v13 = vmax.f32 %v280_v9, %v281_v11  ;;  %v288_v14 = vrot.slane %v287_v12, 1  ;;  %v578_v9 = vsel %vm348_vm3, 1.0, %v775_v8 }
  0x5e   : > { %v306_v43 = vadd.f32 %v305_v37, %v304_v31  ;;  %v313_v46 = vadd.f32 %v312_v40, %v311_v34  ;;  %v403_v11 = vrot.slane %v578_v9, %v941_v20 }
  0x5f   : > { %v289_v16 = vmax.f32 %v287_v12, %v288_v14  ;;  %v407_v12 = vrot.slane %v578_v9, %v943_v23 }
  0x60   : > { %v307_v49 = vrot.slane %v306_v43, 2  ;;  %v314_v51 = vrot.slane %v313_v46, 2 }
  0x61   : > { %v320_v18 = vcombine.low %v282_v13, %v289_v16  ;;  %v411_v17 = vsel %vm381_vm4, %v407_v12, 0.0 }
  0x62   : > { %v308_v52 = vadd.f32 %v307_v49, %v306_v43  ;;  %v315_v53 = vadd.f32 %v314_v51, %v313_v46 }
  0x63   : > { %v322_v19 = vsub.f32 %v270_v0, %v320_v18 }
  0x64   : > { %v309_v54 = vrot.slane %v308_v52, 1  ;;  %v316_v55 = vrot.slane %v315_v53, 1 }
  0x65   : > { %v323_v21 = vmul.f32 1.442695, %v322_v19  ;;  %v410_v19 = vsel %vm381_vm4, %v403_v11, 0.0 }
  0x66   : > { %v310_v59 = vadd.f32 %v309_v54, %v308_v52  ;;  %v317_v62 = vadd.f32 %v316_v55, %v315_v53  ;;  %v412_v22 = vadd.f32 %v411_v17, %v410_v19 }
  0x67   : > { %650 = vpow2.f32 %v323_v21 }
  0x71   : > { %v651_v27 = vpop.eup %650 }
  0x72   : > { %v326_v29 = vcombine.high %v651_v27, %v651_v27  ;;  %v328_v30 = vsel %vm275_vm0, %v651_v27, 0.0 }
  0x73   : > { %v329_v32 = vrot.slane %v328_v30, 4 }
  0x74   : > { %v335_v33 = vsel %vm275_vm0, %v326_v29, 0.0 }
  0x75   : > { %v330_v35 = vadd.f32 %v329_v32, %v328_v30  ;;  %v336_v36 = vrot.slane %v335_v33, 4 }
  0x77   : > { %v331_v38 = vrot.slane %v330_v35, 2  ;;  %v337_v39 = vadd.f32 %v336_v36, %v335_v33 }
  0x79   : > { %v332_v41 = vadd.f32 %v331_v38, %v330_v35  ;;  %v338_v42 = vrot.slane %v337_v39, 2 }
  0x7b   : > { %v333_v44 = vrot.slane %v332_v41, 1  ;;  %v339_v45 = vadd.f32 %v338_v42, %v337_v39 }
  0x7d   : > { %v334_v47 = vadd.f32 %v333_v44, %v332_v41  ;;  %v340_v48 = vrot.slane %v339_v45, 1 }
  0x7f   : > { %v341_v50 = vadd.f32 %v340_v48, %v339_v45  ;;  %652 = vlog2.f32 %v334_v47 }
  0x81   : > { %654 = vlog2.f32 %v341_v50 }
  0x89   : > { %v653_v58 = vpop.eup %652 }
  0x8a   : > { %v343_v60 = vmul.f32 0.6931472, %v653_v58 }
  0x8b   : > { %v655_v61 = vpop.eup %654 }
  0x8c   : > { %v345_v63 = vmul.f32 0.6931472, %v655_v61  ;;  %v346_v0 = vadd.f32 %v343_v60, %v282_v13 }
  0x8e   : > { %v347_v2 = vadd.f32 %v345_v63, %v289_v16  ;;  %v349_v3 = vsub.f32 %v346_v0, %v310_v59 }
  0x90   : > { %v350_v4 = vsub.f32 %v347_v2, %v317_v62 }
  0x92   : > { %v353_v6 = vcombine.low %v349_v3, %v350_v4 }
  0x94   : > { %v360_v7 = vrot.slane %v353_v6, %v359_v5 }
  0x96   : > { %v367_v10 = vrot.slane %v360_v7, %v359_v5 }
  0x98   : > { %v369_v14 = vsel %vm348_vm3, %v367_v10, 0.0 }
  0x99   : > { %v374_v15 = vrot.slane %v369_v14, %v941_v20  ;;  %v378_v13 = vrot.slane %v369_v14, %v943_v23 }
  0x9b   : > { %v382_v16 = vsel %vm381_vm4, %v374_v15, 0.0  ;;  %v383_v18 = vsel %vm381_vm4, %v378_v13, 0.0 }
  0x9c   : > { %v384_v21 = vadd.f32 %v383_v18, %v382_v16 }
  0x9e   : > { %385 = vadd.xlane.f32.xlu0 %v384_v21 }
  0xa2   : > { %413 = vadd.xlane.f32.xlu0 %v412_v22 }
 0x12b   : > { %v386_v24 = vpop.xlane.xlu0 %385 }
 0x12c   : > { %v387_v25 = vrot.slane %v386_v24, 4 }
 0x12e   : > { %v388_v26 = vadd.f32 %v387_v25, %v386_v24 }
 0x12f   : > { %v414_v27 = vpop.xlane.xlu0 %413 }
 0x130   : > { %v389_v28 = vrot.slane %v388_v26, 2  ;;  %v415_v29 = vrot.slane %v414_v27, 4 }
 0x132   : > { %v416_v30 = vadd.f32 %v415_v29, %v414_v27  ;;  %v390_v20 = vadd.f32 %v389_v28, %v388_v26 }
 0x134   : > { %v417_v31 = vrot.slane %v416_v30, 2  ;;  %v391_v23 = vrot.slane %v390_v20, 1 }
 0x136   : > { %v418_v32 = vadd.f32 %v417_v31, %v416_v30  ;;  %v392_v33 = vadd.f32 %v391_v23, %v390_v20 }
 0x138   : > { %583 = vpush %v392_v33  ;;  %v419_v34 = vrot.slane %v418_v32, 1 }
 0x13a   : > { %v420_v35 = vadd.f32 %v419_v34, %v418_v32 }
 0x13c   : > { %585 = vpush %v420_v35 }
 0x169   : > { %s584_s11 = spop %583 }
 0x16a   : > { %v394_v36 = vstv %s584_s11 }
 0x16b   : > { %396 = vst.msk [vmem:[%s263_s9] sm:$0x1] %vm395_vm5, %v394_v36 }
 0x16d   : > { %s586_s20 = spop %585 }
 0x16e   : > { %v422_v37 = vstv %s586_s20 }
 0x16f   : > { %423 = vst.msk [vmem:[%s269_s18] sm:$0x1] %vm395_vm5, %v422_v37 }
 0x170 PF: > { %s20_s17 = sadd.s32 1, %s770_s17   ;;  %s994_s12 = smov %s754_s13 }
 0x171   : > { %p17_p9 = scmp.ge.s32.totalorder %s20_s17, 4   ;;  %s995_s13 = smov %s758_s14 }
 0x172   : > { %s996_s14 = smov %s845_s24  ;;  %s997_s15 = smov %s766_s16 }
 0x173   : > { %s998_s16 = smov %s1000_s19  ;;  %19 = sbr.rel (!%p17_p9) target bundleno = 6 (0x6), region = 93 }
 0x17a   :  { %465 = vsyncpa [#allocation3], 1 }
 0x17b   :  { %467 = vsyncpa [#allocation3 + $0x1], 1 }
 0x17c   :  { %468 = vsyncpa [#allocation5], 1 }
 0x17d   :  { %470 = vsyncpa [#allocation5 + $0x1], 1 }

</bundles_post_ra>
